<compile_context>
chip_gen: v7x
topology: tpu7x:2x2x1
jax: 0.10.0
libtpu: 0.0.40
codegen_flags: <defaults>
</compile_context>

<pallas_src>
import jax
import jax.numpy as jnp
from jax.experimental import pallas as pl
from jax.experimental.pallas import tpu as pltpu


def _round_up(x: int, n: int) -> int:
  return ((x + n - 1) // n) * n


def _head_kernel(xk_ref, xv_ref, z_ref, pad_ref,
                 wkp_ref, wvp_ref, bz_ref, sel_ref,
                 out_ref):
  """One tile of TM rows (row = one (batch, cat-feature) pair)."""
  z = z_ref[...]                                                  # [TM, Z]

  # Project z into raw key-feature space and (pre-tiled over classes) raw
  # value-feature space.  wvp already replicates Wv^T K times wrapper-side,
  # so pv_tiled lines up lane-for-lane with the lane-dense xv tile.
  pk = jnp.dot(z, wkp_ref[...], preferred_element_type=jnp.float32)        # [TM, Dk]
  pv_tiled = jnp.dot(z, wvp_ref[...], preferred_element_type=jnp.float32)  # [TM, K*Dv]

  # Class-independent contribution:  xk . pk  +  z . concat(bk, bv).
  row_logit = (jnp.sum(xk_ref[...] * pk, axis=-1, keepdims=True)
               + jnp.sum(z * bz_ref[...], axis=-1, keepdims=True))         # [TM, 1]

  # Per-class contribution: the static 0/1 block-diagonal selector sums each
  # class's Dv-lane slice of (xv * pv_tiled) -- one MXU push instead of an
  # in-kernel 3D reshape + cross-lane reduction.
  val_logit = jnp.dot(xv_ref[...] * pv_tiled, sel_ref[...],
                      preferred_element_type=jnp.float32)                  # [TM, K]

  logits = row_logit + val_logit                                           # [TM, K]

  # Padding mask (int8): keep logits where padding != 0, else -inf.
  valid = pad_ref[...].astype(jnp.int32) != 0
  out_ref[...] = jnp.where(valid, logits, -jnp.inf)


def _pick_tile(m: int, row_bytes: int, const_bytes: int,
               budget_bytes: int) -> int:
  """VMEM-aware row-tile size: big tiles; >= 2 grid steps once M > 256."""
  m8 = _round_up(m, 8)
  # Rows per (double-buffered) tile that keep all blocks under the budget.
  cap = max(32, (budget_bytes - const_bytes) // (2 * row_bytes))
  if m8 <= 256 and cap >= m8:
    return m8                      # one tile; every block == full padded array
  # Large tile (up to 2048), VMEM-capped, and small enough that the grid has
  # at least 2 steps so v7x's two TensorCores both get work.  Multiples of 32
  # keep even the int8 padding blocks tile-aligned.
  tm = min(2048, cap, _round_up(-(-m // 2), 32))
  tm = max(32, (tm // 32) * 32)
  # Tie-break only: prefer an exact divisor of M (skips the wrapper pad copy).
  for cand in range(tm, max(32, tm // 2) - 1, -32):
    if m % cand == 0:
      return cand
  return tm


def ingestables_classification_forward(z_emb, x_keys, x_vals_all, padding,
                                        wk, bk, wv, bv,
                                        cast_inputs_to_bf16: bool = False):
  """Pallas forward.

  Args:
    z_emb:      [B, N, Z]       float32   (Z = key_dim + val_dim)
    x_keys:     [B, N, Dk]      float32
    x_vals_all: [B, N, K, Dv]   float32
    padding:    [B, N, K]       bool/int  (nonzero = valid class)
    wk, bk:     [Dk, key_dim], [key_dim]
    wv, bv:     [Dv, val_dim], [val_dim]
    cast_inputs_to_bf16: halve HBM traffic on the activation streams
      (accumulation stays f32).  Default False for f32 parity with PyTorch.

  Returns:
    logits: [B, N, K] float32
  """
  b, n, z_dim = z_emb.shape
  _, _, k, dv = x_vals_all.shape
  dk = x_keys.shape[-1]
  key_dim = wk.shape[1]
  val_dim = wv.shape[1]
  assert key_dim + val_dim == z_dim

  m = b * n
  f32 = jnp.float32
  in_dtype = jnp.bfloat16 if cast_inputs_to_bf16 else f32

  # ---- lane-dense 2D views (contiguous reshapes: no extra HBM pass) ----
  xk2 = x_keys.reshape(m, dk).astype(in_dtype)
  xv2 = x_vals_all.reshape(m, k * dv).astype(in_dtype)
  z2 = z_emb.reshape(m, z_dim).astype(in_dtype)
  pad2 = padding.reshape(m, k).astype(jnp.int8)

  # ---- small static operands: fold split / class-tiling / bias into weights ----
  wkp = jnp.concatenate(
      [wk.T.astype(f32), jnp.zeros((val_dim, dk), f32)], axis=0).astype(in_dtype)
  wvp = jnp.concatenate(
      [jnp.zeros((key_dim, k * dv), f32),
       jnp.tile(wv.T.astype(f32), (1, k))], axis=0).astype(in_dtype)
  bz2 = jnp.concatenate([bk, bv]).astype(f32).reshape(1, z_dim)
  sel = (jnp.arange(k * dv)[:, None] // dv
         == jnp.arange(k)[None, :]).astype(f32)                  # [K*Dv, K]

  # ---- VMEM-aware row tile (lane-padded block widths, double-buffered) ----
  def lane(w):
    return max(128, _round_up(w, 128))
  row_bytes = (4 * (lane(dk) + lane(k * dv) + lane(z_dim) + lane(k))   # xk,xv,z,out
               + lane(k))                                              # int8 pad
  const_bytes = 2 * 4 * (_round_up(z_dim, 8) * (lane(dk) + lane(k * dv))
                         + 8 * lane(z_dim)
                         + _round_up(k * dv, 8) * lane(k))
  budget = 26 * 1024 * 1024           # <= 32 MiB scoped limit on every gen
  tm = _pick_tile(m, row_bytes, const_bytes, budget)

  m_pad = _round_up(m, tm)
  if m_pad != m:
    pr = m_pad - m
    xk2 = jnp.pad(xk2, ((0, pr), (0, 0)))
    xv2 = jnp.pad(xv2, ((0, pr), (0, 0)))
    z2 = jnp.pad(z2, ((0, pr), (0, 0)))
    pad2 = jnp.pad(pad2, ((0, pr), (0, 0)))       # zero padding -> -inf rows
  grid = (m_pad // tm,)

  out = pl.pallas_call(
      _head_kernel,
      out_shape=jax.ShapeDtypeStruct((m_pad, k), jnp.float32),
      grid_spec=pltpu.PrefetchScalarGridSpec(
          num_scalar_prefetch=0,
          grid=grid,
          in_specs=[
              pl.BlockSpec((tm, dk), lambda i: (i, 0)),          # x_keys
              pl.BlockSpec((tm, k * dv), lambda i: (i, 0)),      # x_vals (lane-dense)
              pl.BlockSpec((tm, z_dim), lambda i: (i, 0)),       # z_emb
              pl.BlockSpec((tm, k), lambda i: (i, 0)),           # padding (int8)
              pl.BlockSpec((z_dim, dk), lambda i: (0, 0)),       # wkp  (constant)
              pl.BlockSpec((z_dim, k * dv), lambda i: (0, 0)),   # wvp  (constant)
              pl.BlockSpec((1, z_dim), lambda i: (0, 0)),        # bz   (constant)
              pl.BlockSpec((k * dv, k), lambda i: (0, 0)),       # sel  (constant)
          ],
          out_specs=pl.BlockSpec((tm, k), lambda i: (i, 0)),
      ),
      compiler_params=pltpu.CompilerParams(
          dimension_semantics=("parallel",),
          vmem_limit_bytes=32 * 1024 * 1024),
  )(xk2, xv2, z2, pad2, wkp, wvp, bz2, sel)

  return out[:m].reshape(b, n, k)


def _reference(z_emb, x_keys, x_vals_all, padding, wk, bk, wv, bv):
  """Plain-JAX reference mirroring the PyTorch forward (full-f32 matmuls)."""
  with jax.default_matmul_precision("float32"):
    xk_exp = jnp.broadcast_to(x_keys[..., None, :],
                              x_vals_all.shape[:-1] + (x_keys.shape[-1],))
    z_key_embs_all = xk_exp @ wk + bk
    z_val_embs_all = x_vals_all @ wv + bv
    z_embs_all = jnp.concatenate([z_key_embs_all, z_val_embs_all], axis=-1)
    logits = jnp.einsum('...nd,...nkd->...nk', z_emb, z_embs_all)
  return jnp.where(padding != 0, logits, -jnp.inf)


def _make_case(key, b, n, k, dk, dv, key_dim, val_dim):
  z = key_dim + val_dim
  ks = jax.random.split(key, 8)
  z_emb = jax.random.normal(ks[0], (b, n, z), dtype=jnp.float32)
  x_keys = jax.random.normal(ks[1], (b, n, dk), dtype=jnp.float32)
  x_vals_all = jax.random.normal(ks[2], (b, n, k, dv), dtype=jnp.float32)
  # Per-feature number of valid classes; padding nonzero where class is valid.
  num_classes = jax.random.randint(ks[3], (n,), 2, k + 1)
  padding = (jnp.arange(k)[None, None, :] < num_classes[None, :, None])
  padding = jnp.broadcast_to(padding, (b, n, k)).astype(jnp.int32)
  wk = 0.1 * jax.random.normal(ks[4], (dk, key_dim), dtype=jnp.float32)
  bk = 0.01 * jax.random.normal(ks[5], (key_dim,), dtype=jnp.float32)
  wv = 0.1 * jax.random.normal(ks[6], (dv, val_dim), dtype=jnp.float32)
  bv = 0.01 * jax.random.normal(ks[7], (val_dim,), dtype=jnp.float32)
  return z_emb, x_keys, x_vals_all, padding, wk, bk, wv, bv


def _check(args):
  z_emb, x_keys, x_vals_all, padding, wk, bk, wv, bv = args
  logits = ingestables_classification_forward(
      z_emb, x_keys, x_vals_all, padding, wk, bk, wv, bv)
  logits = jax.block_until_ready(logits)
  ref = _reference(z_emb, x_keys, x_vals_all, padding, wk, bk, wv, bv)
  finite = padding != 0
  assert logits.shape == padding.shape
  # Every padded class slot must be exactly -inf.
  assert bool(jnp.all(jnp.where(finite, True, jnp.isneginf(logits))))
  # Valid slots must match the plain-JAX reference (accumulation order differs
  # from the reference due to the algebraic refactor -> tolerance equality).
  assert bool(jnp.allclose(jnp.where(finite, logits, 0.0),
                           jnp.where(finite, ref, 0.0),
                           atol=2e-3, rtol=2e-3))


if __name__ == "__main__":
  key = jax.random.PRNGKey(0)
  k1, k2 = jax.random.split(key)
  # Small demo shape (single full-array tile): batch=2, num_cat_feats=4, K=8.
  _check(_make_case(k1, b=2, n=4, k=8, dk=16, dv=16, key_dim=16, val_dim=16))
  # Ragged, multi-tile shape: exercises the padded-M path and the 2-step
  # "parallel" grid (v7x dual-TensorCore split).
  _check(_make_case(k2, b=8, n=81, k=8, dk=16, dv=16, key_dim=16, val_dim=16))
  print("KERNEL_OK")
</pallas_src>

<mosaic_0001>
module attributes {stable_mosaic.version = 11 : i64} {
  func.func @_head_kernel(%arg0: i32, %arg1: memref<8x16xf32, #tpu.memory_space<vmem>>, %arg2: memref<8x128xf32, #tpu.memory_space<vmem>>, %arg3: memref<8x32xf32, #tpu.memory_space<vmem>>, %arg4: memref<8x8xi8, #tpu.memory_space<vmem>>, %arg5: memref<32x16xf32, #tpu.memory_space<vmem>>, %arg6: memref<32x128xf32, #tpu.memory_space<vmem>>, %arg7: memref<1x32xf32, #tpu.memory_space<vmem>>, %arg8: memref<128x8xf32, #tpu.memory_space<vmem>>, %arg9: memref<8x8xf32, #tpu.memory_space<vmem>>) attributes {dimension_semantics = [#tpu.dimension_semantics<parallel>], iteration_bounds = array<i64: 1>, scalar_prefetch = 0 : i64, scratch_operands = 0 : i64, tpu.core_type = #tpu.core_type<tc>, window_params = [{transform_indices = @transform_0, window_bounds = array<i64: 8, 16>}, {transform_indices = @transform_1, window_bounds = array<i64: 8, 128>}, {transform_indices = @transform_2, window_bounds = array<i64: 8, 32>}, {transform_indices = @transform_3, window_bounds = array<i64: 8, 8>}, {pipeline_mode = #tpu.pipeline_mode<synchronous>, transform_indices = @transform_4, window_bounds = array<i64: 32, 16>}, {pipeline_mode = #tpu.pipeline_mode<synchronous>, transform_indices = @transform_5, window_bounds = array<i64: 32, 128>}, {pipeline_mode = #tpu.pipeline_mode<synchronous>, transform_indices = @transform_6, window_bounds = array<i64: 1, 32>}, {pipeline_mode = #tpu.pipeline_mode<synchronous>, transform_indices = @transform_7, window_bounds = array<i64: 128, 8>}, {transform_indices = @transform_8, window_bounds = array<i64: 8, 8>}]} {
    %c0 = arith.constant 0 : index
    %c0_0 = arith.constant 0 : index
    %0 = vector.load %arg3[%c0, %c0_0] : memref<8x32xf32, #tpu.memory_space<vmem>>, vector<8x32xf32>
    %c0_1 = arith.constant 0 : index
    %c0_2 = arith.constant 0 : index
    %1 = vector.load %arg5[%c0_1, %c0_2] : memref<32x16xf32, #tpu.memory_space<vmem>>, vector<32x16xf32>
    %cst = arith.constant dense<0.000000e+00> : vector<8x16xf32>
    %2 = tpu.matmul %0, %1, %cst {dimension_numbers = #tpu.dot_dimension_numbers<[1], [0], [0], [1], [0, 0, 1, 1], [], []>} : vector<8x32xf32>, vector<32x16xf32>, vector<8x16xf32> -> vector<8x16xf32>
    %c0_3 = arith.constant 0 : index
    %c0_4 = arith.constant 0 : index
    %3 = vector.load %arg6[%c0_3, %c0_4] : memref<32x128xf32, #tpu.memory_space<vmem>>, vector<32x128xf32>
    %cst_5 = arith.constant dense<0.000000e+00> : vector<8x128xf32>
    %4 = tpu.matmul %0, %3, %cst_5 {dimension_numbers = #tpu.dot_dimension_numbers<[1], [0], [0], [1], [0, 0, 1, 1], [], []>} : vector<8x32xf32>, vector<32x128xf32>, vector<8x128xf32> -> vector<8x128xf32>
    %c0_6 = arith.constant 0 : index
    %c0_7 = arith.constant 0 : index
    %5 = vector.load %arg1[%c0_6, %c0_7] : memref<8x16xf32, #tpu.memory_space<vmem>>, vector<8x16xf32>
    %6 = arith.mulf %5, %2 : vector<8x16xf32>
    %cst_8 = arith.constant dense<0.000000e+00> : vector<8xf32>
    %7 = vector.multi_reduction <add>, %6, %cst_8 [1] : vector<8x16xf32> to vector<8xf32>
    %8 = vector.shape_cast %7 : vector<8xf32> to vector<8x1xf32>
    %c0_9 = arith.constant 0 : index
    %c0_10 = arith.constant 0 : index
    %9 = vector.load %arg7[%c0_9, %c0_10] : memref<1x32xf32, #tpu.memory_space<vmem>>, vector<1x32xf32>
    %10 = vector.broadcast %9 : vector<1x32xf32> to vector<8x32xf32>
    %11 = arith.mulf %0, %10 : vector<8x32xf32>
    %cst_11 = arith.constant dense<0.000000e+00> : vector<8xf32>
    %12 = vector.multi_reduction <add>, %11, %cst_11 [1] : vector<8x32xf32> to vector<8xf32>
    %13 = vector.shape_cast %12 : vector<8xf32> to vector<8x1xf32>
    %14 = arith.addf %8, %13 : vector<8x1xf32>
    %c0_12 = arith.constant 0 : index
    %c0_13 = arith.constant 0 : index
    %15 = vector.load %arg2[%c0_12, %c0_13] : memref<8x128xf32, #tpu.memory_space<vmem>>, vector<8x128xf32>
    %16 = arith.mulf %15, %4 : vector<8x128xf32>
    %c0_14 = arith.constant 0 : index
    %c0_15 = arith.constant 0 : index
    %17 = vector.load %arg8[%c0_14, %c0_15] : memref<128x8xf32, #tpu.memory_space<vmem>>, vector<128x8xf32>
    %cst_16 = arith.constant dense<0.000000e+00> : vector<8x8xf32>
    %18 = tpu.matmul %16, %17, %cst_16 {dimension_numbers = #tpu.dot_dimension_numbers<[1], [0], [0], [1], [0, 0, 1, 1], [], []>} : vector<8x128xf32>, vector<128x8xf32>, vector<8x8xf32> -> vector<8x8xf32>
    %19 = vector.broadcast %14 : vector<8x1xf32> to vector<8x8xf32>
    %20 = arith.addf %19, %18 : vector<8x8xf32>
    %c0_17 = arith.constant 0 : index
    %c0_18 = arith.constant 0 : index
    %21 = vector.load %arg4[%c0_17, %c0_18] : memref<8x8xi8, #tpu.memory_space<vmem>>, vector<8x8xi8>
    %22 = arith.extsi %21 : vector<8x8xi8> to vector<8x8xi32>
    %c0_i32 = arith.constant 0 : i32
    %23 = vector.broadcast %c0_i32 : i32 to vector<8x8xi32>
    %24 = arith.cmpi ne, %22, %23 : vector<8x8xi32>
    %cst_19 = arith.constant 0xFF800000 : f32
    %25 = vector.broadcast %cst_19 : f32 to vector<8x8xf32>
    %26 = arith.select %24, %20, %25 : vector<8x8xi1>, vector<8x8xf32>
    %c0_20 = arith.constant 0 : index
    %c0_21 = arith.constant 0 : index
    %27 = vector.load %arg9[%c0_20, %c0_21] : memref<8x8xf32, #tpu.memory_space<vmem>>, vector<8x8xf32>
    tpu.vector_store %arg9[%c0_20, %c0_21], %26 {strides = array<i32>} : memref<8x8xf32, #tpu.memory_space<vmem>>, vector<8x8xf32>,
    return
  }
  func.func @transform_0(%arg0: i32) -> (i32, i32) {
    %c0_i32 = arith.constant 0 : i32
    %c0_i32_0 = arith.constant 0 : i32
    return %arg0, %c0_i32 : i32, i32
  }
  func.func @transform_1(%arg0: i32) -> (i32, i32) {
    %c0_i32 = arith.constant 0 : i32
    %c0_i32_0 = arith.constant 0 : i32
    return %arg0, %c0_i32 : i32, i32
  }
  func.func @transform_2(%arg0: i32) -> (i32, i32) {
    %c0_i32 = arith.constant 0 : i32
    %c0_i32_0 = arith.constant 0 : i32
    return %arg0, %c0_i32 : i32, i32
  }
  func.func @transform_3(%arg0: i32) -> (i32, i32) {
    %c0_i32 = arith.constant 0 : i32
    %c0_i32_0 = arith.constant 0 : i32
    return %arg0, %c0_i32 : i32, i32
  }
  func.func @transform_4(%arg0: i32) -> (i32, i32) {
    %c0_i32 = arith.constant 0 : i32
    %c0_i32_0 = arith.constant 0 : i32
    %c0_i32_1 = arith.constant 0 : i32
    return %c0_i32, %c0_i32_0 : i32, i32
  }
  func.func @transform_5(%arg0: i32) -> (i32, i32) {
    %c0_i32 = arith.constant 0 : i32
    %c0_i32_0 = arith.constant 0 : i32
    %c0_i32_1 = arith.constant 0 : i32
    return %c0_i32, %c0_i32_0 : i32, i32
  }
  func.func @transform_6(%arg0: i32) -> (i32, i32) {
    %c0_i32 = arith.constant 0 : i32
    %c0_i32_0 = arith.constant 0 : i32
    %c0_i32_1 = arith.constant 0 : i32
    return %c0_i32, %c0_i32_0 : i32, i32
  }
  func.func @transform_7(%arg0: i32) -> (i32, i32) {
    %c0_i32 = arith.constant 0 : i32
    %c0_i32_0 = arith.constant 0 : i32
    %c0_i32_1 = arith.constant 0 : i32
    return %c0_i32, %c0_i32_0 : i32, i32
  }
  func.func @transform_8(%arg0: i32) -> (i32, i32) {
    %c0_i32 = arith.constant 0 : i32
    %c0_i32_0 = arith.constant 0 : i32
    return %arg0, %c0_i32 : i32, i32
  }
}

</mosaic_0001>

<bundles_post_ra>
// kernel: tpu_custom_call.1
= control target key start
LH: loop header
LB: loop body
LE: loop exit
PB: predicated region body
PF: predicated region fallthrough
CT: control target
= control target key end

     0   :  { %v461_v3 = vmov 0.0|0.0   ;;  %vm462_vm0 = vmmov 0   ;;  %v463_v6 = vmov 0.0   ;;  %s627_s0 = inlined_call_operand.vmem [shape: f32[8,16], index: 0, kind: input, shape index: {}]   ;;  %s628_s1 = inlined_call_operand.vmem [shape: f32[8,128], index: 1, kind: input, shape index: {}]   ;;  %s629_s2 = inlined_call_operand.vmem [shape: f32[8,32], index: 2, kind: input, shape index: {}]   ;;  %s630_s3 = inlined_call_operand.vmem [shape: s8[8,8], index: 3, kind: input, shape index: {}]   ;;  %s631_s4 = inlined_call_operand.vmem [shape: f32[32,16], index: 4, kind: input, shape index: {}]   ;;  %s632_s5 = inlined_call_operand.vmem [shape: f32[32,128], index: 5, kind: input, shape index: {}]   ;;  %s633_s6 = inlined_call_operand.vmem [shape: f32[1,32], index: 6, kind: input, shape index: {}]   ;;  %s634_s7 = inlined_call_operand.vmem [shape: f32[128,8], index: 7, kind: input, shape index: {}]   ;;  %s635_s8 = inlined_call_operand.hbm [shape: f32[8,8], index: 8, kind: output, shape index: {}]  }
   0x1   :  { %v31_v0 = vld [vmem:[%s631_s4] sm:$0xff]  ;;  %v32_v1 = vld [vmem:[%s631_s4 + $0x8] sm:$0xff]  ;;  %v33_v2 = vld [vmem:[%s631_s4 + $0x10] sm:$0xff]  ;;  %397 = vmatprep.subr.bf16.mxu1 %v461_v3  ;;  %348 = vmatprep.mubr.msk.f32.mxu1 %vm462_vm0, %v463_v6 }
   0x2   :  { %v398_v4 = vpack.c.bf16 %v32_v1, %v31_v0  ;;  %v34_v5 = vld [vmem:[%s631_s4 + $0x18] sm:$0xff]  ;;  %409 = vmatprep.subr.bf16.mxu0 %v461_v3  ;;  %394 = vmatprep.mubr.msk.f32.mxu0 %vm462_vm0, %v463_v6  ;;  %v203_v8 = vld [vmem:[%s634_s7] sm:$0xff]  ;;  %v204_v9 = vld [vmem:[%s634_s7 + $0x8] sm:$0xff] }
   0x3   :  { %v401_v7 = vpack.c.bf16 %v34_v5, %v33_v2  ;;  %v205_v10 = vld [vmem:[%s634_s7 + $0x10] sm:$0xff]  ;;  %v109_v11 = vld [vmem:[%s632_s5] sm:$0xff]  ;;  %v110_v12 = vld [vmem:[%s632_s5 + $0x8] sm:$0xff]  ;;  %v410_v13 = vpack.c.bf16 %v204_v9, %v203_v8 }
   0x4   :  { %399 = vmatpush3.bf16.msra.mxu1 %v398_v4  ;;  %v206_v14 = vld [vmem:[%s634_s7 + $0x18] sm:$0xff] }
   0x5   :  { %400 = vmatprep.subr.bf16.mxu1 %v461_v3  ;;  %411 = vmatpush3.bf16.msra.mxu0 %v410_v13  ;;  %v413_v15 = vpack.c.bf16 %v206_v14, %v205_v10 }
   0x6   :  { %13 = vsyncpa [#allocation3], 0  ;;  %v30_v16 = vld [vmem:[%s629_s2] sm:$0xff]  ;;  %vm35_vm1 = vcmask 261120   ;;  %v404_v17 = vpack.c.bf16 %v110_v12, %v109_v11  ;;  %412 = vmatprep.subr.bf16.mxu0 %v461_v3  ;;  %v208_v19 = vld [vmem:[%s634_s7 + $0x28] sm:$0xff]  ;;  %vm185_vm2 = vcmask 130048  }
   0x7   :  { %v207_v18 = vld [vmem:[%s634_s7 + $0x20] sm:$0xff]  ;;  %v111_v20 = vld [vmem:[%s632_s5 + $0x10] sm:$0xff]  ;;  %v112_v21 = vld [vmem:[%s632_s5 + $0x18] sm:$0xff]  ;;  %s464_s11 = smov [#allocation2]   ;;  %vm294_vm4 = vcmask 64512  }
   0x8   :  { %402 = vmatpush3.bf16.msra.mxu1 %v401_v7  ;;  %v416_v22 = vpack.c.bf16 %v208_v19, %v207_v18  ;;  %v407_v23 = vpack.c.bf16 %v112_v21, %v111_v20  ;;  %v209_v24 = vld [vmem:[%s634_s7 + $0x30] sm:$0xff]  ;;  %v210_v25 = vld [vmem:[%s634_s7 + $0x38] sm:$0xff]  ;;  %v211_v27 = vld [vmem:[%s634_s7 + $0x40] sm:$0xff]  ;;  %s302_s12 = sshll.u32 %s464_s11, 4  ;;  %s303_s12 = int_to_ptr.vmem [resolvable:$true] %s302_s12 }
   0x9   :  { %403 = vmatprep.subr.bf16.mxu1 %v461_v3  ;;  %414 = vmatpush3.bf16.msra.mxu0 %v413_v15  ;;  %v419_v26 = vpack.c.bf16 %v210_v25, %v209_v24  ;;  %v212_v28 = vld [vmem:[%s634_s7 + $0x48] sm:$0xff]  ;;  %v213_v30 = vld [vmem:[%s634_s7 + $0x50] sm:$0xff]  ;;  %v214_v31 = vld [vmem:[%s634_s7 + $0x58] sm:$0xff]  ;;  %p442_p1 = scmp.lt.s32.totalorder %s303_s12, %s303_s12 }
   0xa   :  { %415 = vmatprep.subr.bf16.mxu0 %v461_v3  ;;  %v422_v29 = vpack.c.bf16 %v212_v28, %v211_v27  ;;  %v425_v32 = vpack.c.bf16 %v214_v31, %v213_v30  ;;  %v215_v33 = vld [vmem:[%s634_s7 + $0x60] sm:$0xff]  ;;  %v216_v34 = vld [vmem:[%s634_s7 + $0x68] sm:$0xff]  ;;  %v217_v36 = vld [vmem:[%s634_s7 + $0x70] sm:$0xff] }
   0xb   :  { %349 = vmatmul.mubr.msk.f32.vlgmr.msra.gmra.mrb[0].mxu1 %vm35_vm1, %v30_v16  ;;  %v428_v35 = vpack.c.bf16 %v216_v34, %v215_v33  ;;  %v218_v37 = vld [vmem:[%s634_s7 + $0x78] sm:$0xff]  ;;  %v183_v39 = vld [vmem:[%s627_s0] sm:$0xff] }
   0xc   :  { %405 = vmatpush3.bf16.msra.mxu1 %v404_v17  ;;  %359 = vmatprep.mubr.msk.f32.mxu1 %vm462_vm0, %v463_v6  ;;  %v431_v38 = vpack.c.bf16 %v218_v37, %v217_v36  ;;  %v312_v40 = vld [vmem:[%s633_s6] ss:$0 sm:$0xff] }
   0xd   :  { %406 = vmatprep.subr.bf16.mxu1 %v461_v3  ;;  %417 = vmatpush3.bf16.msra.mxu0 %v416_v22  ;;  %v196_v44 = vmul.f32 %v312_v40, %v30_v16  ;;  %v201_v47 = vld [vmem:[%s628_s1] sm:$0xff]  ;;  %s437_s1 = scalar_lea.vmem %s303_s12, 128 }
   0xe   :  { %418 = vmatprep.subr.bf16.mxu0 %v461_v3  ;;  %v290_v52 = vld [vmem:[%s630_s3] sm:$0x3]  ;;  %p438_p0 = scmp.ne.s32.totalorder %s303_s12, %s437_s1  ;;  %p443_p2 = scmp.lt.s32.totalorder %s437_s1, %s437_s1 }
   0xf   :  { %v197_v46 = vsel %vm35_vm1, %v196_v44, 0.0  ;;  %v291_v54 = vunpack.c.0.s8 %v290_v52 }
  0x10   :  { %408 = vmatpush3.bf16.msra.mxu1 %v407_v23  ;;  %p444_p3 = por %p443_p2, %p442_p1 }
  0x11   :  { %420 = vmatpush3.bf16.msra.mxu0 %v419_v26  ;;  %vm292_vm3 = vcmp.ne.s32.totalorder %v291_v54, 0 }
  0x12   :  { %421 = vmatprep.subr.bf16.mxu0 %v461_v3  ;;  %p445_p4 = pnand %p444_p3, %p438_p0 }
  0x13   :  { %360 = vmatmul.mubr.msk.f32.vlgmr.msra.gmra.mrb[2].mxu1 %vm35_vm1, %v30_v16 }
  0x15   :  { %423 = vmatpush3.bf16.msra.mxu0 %v422_v29 }
  0x16   :  { %424 = vmatprep.subr.bf16.mxu0 %v461_v3 }
  0x19   :  { %426 = vmatpush3.bf16.msra.mxu0 %v425_v32 }
  0x1a   :  { %427 = vmatprep.subr.bf16.mxu0 %v461_v3 }
  0x1d   :  { %429 = vmatpush3.bf16.msra.mxu0 %v428_v35 }
  0x1e   :  { %430 = vmatprep.subr.bf16.mxu0 %v461_v3 }
  0x21   :  { %432 = vmatpush3.bf16.msra.mxu0 %v431_v38 }
  0xde   :  { %v105_v41 = vpop.f32.mrb[0].mxu1 }
  0xdf   :  { %v184_v42 = vmul.f32 %v183_v39, %v105_v41  ;;  %v350_v43 = vpop.f32.mrb[1].mxu1 }
  0xe1   :  { %v186_v45 = vsel %vm185_vm2, %v184_v42, 0.0 }
  0xe2   :  { %187 = vadd.xlane.f32.xlu0 %v186_v45 }
  0xe6   :  { %198 = vadd.xlane.f32.xlu0 %v197_v46  ;;  %v179_v48 = vpop.f32.mrb[2].mxu1 }
  0xe7   :  { %v202_v49 = vmul.f32 %v201_v47, %v179_v48  ;;  %v361_v50 = vpop.f32.mrb[3].mxu1 }
  0xe9   :  { %395 = vmatmul.mubr.f32.vlgmr.msra.gmra.mrb[0].mxu0 %v202_v49 }
 0x16f   :  { %v188_v51 = vpop.xlane.xlu0 %187 }
 0x173   :  { %v199_v53 = vpop.xlane.xlu0 %198 }
 0x174   :  { %v200_v55 = vadd.f32 %v199_v53, %v188_v51 }
 0x1bc   :  { %v285_v56 = vpop.f32.mrb[0].mxu0 }
 0x1bd   :  { %v289_v57 = vadd.f32 %v285_v56, %v200_v55  ;;  %v396_v58 = vpop.f32.mrb[1].mxu0 }
 0x1bf   :  { %v293_v59 = vsel %vm292_vm3, %v289_v57, -inf }
 0x1c0   :  { %295 = vst.msk [vmem:[#allocation2] sm:$0xff] %vm294_vm4, %v293_v59 }
 0x1c1   :  { %448 = shalt.err (!%p445_p4)
}
 0x1c2   :  { %s449_s14 = scalar_lea.hbm %s635_s8, 128 }
 0x1c3   :  { %p450_p5 = scmp.ne.s32.totalorder %s635_s8, %s449_s14  ;;  %p453_p6 = scmp.lt.u32.totalorder %s449_s14, %s635_s8 }
 0x1c5   :  { %p455_p7 = pnand %p453_p6, %p450_p5 }
 0x1c7   :  { %458 = shalt.err (!%p455_p7)
}
 0x1c8   :  { %305 = dma.vmem_to_hbm [thread:$0]  %s303_s12, 128, %s635_s8, [#allocation3]  }
 0x1c9   :  { %459 = dma.done.wait [#allocation3], 128  }
 0x1ca   :  { %460 = vsyncadd [#allocation3], 4294967168 }
 0x1cb   :  { %309 = vsyncpa [#allocation3], 1 }

</bundles_post_ra>
